<compile_context>
chip_gen: v7x
topology: tpu7x:2x2x1
jax: 0.10.0
libtpu: 0.0.40
codegen_flags: <defaults>
</compile_context>

<pallas_src>
import functools

import jax
import jax.numpy as jnp
from jax import lax
from jax.experimental import pallas as pl
from jax.experimental.pallas import tpu as pltpu

EPS = 1e-5


# --------------------------------------------------------------------------- helpers
def _bn_scale_shift(stats, gamma, beta, count):
    """Training-mode BatchNorm as a per-channel affine (scale, shift).

    stats: (N, C, 2) per-sample [sum, sum_of_squares] over spatial positions.
    gamma, beta: (C, 1).  count: static N*Ho*Wo.
    Returns (C, 1) scale/shift so that bn(y) == y * scale + shift.
    """
    tot = jnp.sum(stats, axis=0)               # (C, 2)
    mean = tot[:, 0:1] / count                 # (C, 1)
    var = tot[:, 1:2] / count - mean * mean    # biased variance (training mode)
    inv = lax.rsqrt(var + EPS)                 # EUP
    scale = gamma * inv
    shift = beta - mean * scale
    return scale, shift


# --------------------------------------------------------------------------- stage 1
def _conv1_bn1stats_kernel(*refs, stride, H, W, Ho, Wo, mxu_dtype, use_proj):
    """conv1 (3x3, pad 1, stride s, bias dropped) + BN1 statistics
    [+ fused 1x1 stride-s projection shortcut].

    inputs : x (1, Cin, H*W), w1 (C, 9*Cin), [w3 (C, Cin), b3 (C, 1)]
    outputs: y1 (1, C, Ho*Wo), st1 (1, C, 2), [sc (1, C, Ho*Wo)]
    scratch: flat (Cin, H*W + 2*(W+1)), col (9*Cin, Ho*Wo)
    """
    it = iter(refs)
    x_ref = next(it)
    w_ref = next(it)
    w3_ref = next(it) if use_proj else None
    b3_ref = next(it) if use_proj else None
    y_ref = next(it)
    st_ref = next(it)
    sc_ref = next(it) if use_proj else None
    flat_ref = next(it)
    col_ref = next(it)

    Cin = x_ref.shape[1]
    P_in = H * W
    P_out = Ho * Wo

    # Flattened zero-halo image: [ 0^(W+1) | x.reshape(Cin, H*W) | 0^(W+1) ].
    # Out-of-image *rows* of a 3x3 tap then read zeros automatically; the two
    # out-of-image *columns* are handled with lane masks below.  Borders are
    # re-zeroed per sample (cheap, and safe under megacore batch splitting).
    flat_ref[:, 0:W + 1] = jnp.zeros((Cin, W + 1), mxu_dtype)
    flat_ref[:, W + 1 + P_in:2 * (W + 1) + P_in] = jnp.zeros((Cin, W + 1), mxu_dtype)
    flat_ref[:, W + 1:W + 1 + P_in] = x_ref[0].astype(mxu_dtype)

    if stride == 1:
        # im2col built once per sample: 9 shifted, masked, lane-dense copies.
        jo = lax.broadcasted_iota(jnp.int32, (1, P_out), 1) % W
        mask_l = jo != 0
        mask_r = jo != W - 1
        for kh in range(3):
            for kw in range(3):
                base = kh * W + kw
                win = flat_ref[:, base:base + P_out]
                if kw == 0:
                    win = jnp.where(mask_l, win, 0.0)
                elif kw == 2:
                    win = jnp.where(mask_r, win, 0.0)
                t = kh * 3 + kw
                col_ref[t * Cin:(t + 1) * Cin, :] = win
    else:
        # Strided conv: gather taps only at the strided output columns while
        # building im2col (tiny 0/1 selection matmul), so the big conv dot
        # below does exactly Ho*Wo columns of MXU work.
        sel = (lax.broadcasted_iota(jnp.int32, (W, Wo), 0)
               == stride * lax.broadcasted_iota(jnp.int32, (W, Wo), 1)
               ).astype(mxu_dtype)                                   # (W, Wo)
        j = lax.broadcasted_iota(jnp.int32, (1, W), 1)
        mask_l = j != 0
        mask_r = j != W - 1
        for io in range(Ho):
            wins = []
            for kh in range(3):
                for kw in range(3):
                    base = (io * stride + kh) * W + kw
                    win = flat_ref[:, base:base + W]
                    if kw == 0:
                        win = jnp.where(mask_l, win, 0.0)
                    elif kw == 2:
                        win = jnp.where(mask_r, win, 0.0)
                    wins.append(win)
            taps = jnp.concatenate(wins, axis=0)                     # (9*Cin, W)
            colr = jnp.dot(taps, sel, preferred_element_type=jnp.float32)
            col_ref[:, io * Wo:(io + 1) * Wo] = colr.astype(mxu_dtype)

    # One full-width MXU pass + one lane-dense (C, Ho*Wo) store per sample.
    # conv bias omitted: a per-channel constant before training-mode BatchNorm
    # is exactly cancelled by the mean subtraction (validated vs. reference).
    y = jnp.dot(w_ref[...], col_ref[...], preferred_element_type=jnp.float32)
    y_ref[0] = y.astype(y_ref.dtype)

    # BN1 per-sample statistics with a single reduction pass.
    st_ref[0] = jnp.concatenate(
        [jnp.sum(y, axis=1, keepdims=True),
         jnp.sum(y * y, axis=1, keepdims=True)], axis=1)

    if use_proj:
        # 1x1 stride-s projection shortcut == W3 @ (centre-tap rows of im2col).
        xc = col_ref[4 * Cin:5 * Cin, :]                             # (Cin, Ho*Wo)
        sc = jnp.dot(w3_ref[...], xc, preferred_element_type=jnp.float32) + b3_ref[...]
        sc_ref[0] = sc.astype(sc_ref.dtype)


# --------------------------------------------------------------------------- stage 2
def _bn1_relu_conv2_bn2stats_kernel(y1_ref, st1_ref, g1_ref, be1_ref, w2_ref,
                                    y2_ref, st2_ref, flat_ref, col_ref,
                                    *, Ho, Wo, count, mxu_dtype):
    """BN1 + ReLU + conv2 (3x3, pad 1, stride 1, bias dropped) + BN2 statistics.

    inputs : y1 (1, C, P), st1 (N, C, 2), g1/be1 (C, 1), w2 (C, 9*C)
    outputs: y2 (1, C, P), st2 (1, C, 2)
    scratch: flat (C, P + 2*(Wo+1)), col (9*C, P)
    """
    C = y1_ref.shape[1]
    P = Ho * Wo

    scale, shift = _bn_scale_shift(st1_ref[...], g1_ref[...], be1_ref[...], count)
    z = jnp.maximum(y1_ref[0] * scale + shift, 0.0)                  # BN1 + ReLU (f32)

    flat_ref[:, 0:Wo + 1] = jnp.zeros((C, Wo + 1), mxu_dtype)
    flat_ref[:, Wo + 1 + P:2 * (Wo + 1) + P] = jnp.zeros((C, Wo + 1), mxu_dtype)
    flat_ref[:, Wo + 1:Wo + 1 + P] = z.astype(mxu_dtype)

    jo = lax.broadcasted_iota(jnp.int32, (1, P), 1) % Wo
    mask_l = jo != 0
    mask_r = jo != Wo - 1
    for kh in range(3):
        for kw in range(3):
            base = kh * Wo + kw
            win = flat_ref[:, base:base + P]
            if kw == 0:
                win = jnp.where(mask_l, win, 0.0)
            elif kw == 2:
                win = jnp.where(mask_r, win, 0.0)
            t = kh * 3 + kw
            col_ref[t * C:(t + 1) * C, :] = win

    y = jnp.dot(w2_ref[...], col_ref[...], preferred_element_type=jnp.float32)
    y2_ref[0] = y.astype(y2_ref.dtype)
    st2_ref[0] = jnp.concatenate(
        [jnp.sum(y, axis=1, keepdims=True),
         jnp.sum(y * y, axis=1, keepdims=True)], axis=1)


# --------------------------------------------------------------------------- stage 3
def _bn2_add_relu_kernel(y2_ref, st2_ref, g2_ref, be2_ref, sc_ref, o_ref, *, count):
    """BN2 + shortcut add + ReLU (shortcut is either x or the fused 1x1 projection)."""
    scale, shift = _bn_scale_shift(st2_ref[...], g2_ref[...], be2_ref[...], count)
    z = y2_ref[0] * scale + shift + sc_ref[0]
    o_ref[0] = jnp.maximum(z, 0.0).astype(o_ref.dtype)


# --------------------------------------------------------------------------- wrapper
def residual_forward(x_nchw, params, *, use_1x1conv=False, strides=1,
                     mxu_dtype=jnp.float32):
    """Pallas implementation of Residual.forward (NCHW in, NCHW out).

    mxu_dtype=jnp.bfloat16 puts the MXU operands (weights + im2col taps) in
    bf16 with f32 accumulation (recommended on v5e/v6e/v7x); BN statistics and
    all elementwise math stay f32.
    """
    x = x_nchw.astype(jnp.float32)
    N, Cin, H, W = x.shape
    s = int(strides)
    Ho = (H - 1) // s + 1
    Wo = (W - 1) // s + 1
    P = Ho * Wo
    C = params["w1"].shape[-1]
    count = float(N * P)

    if not use_1x1conv:
        assert s == 1 and Cin == C, "identity shortcut requires matching shapes"

    # Weight views matching the in-kernel im2col row order m = (kh*3+kw)*Cin + cin.
    w1k = jnp.transpose(params["w1"], (3, 0, 1, 2)).reshape(C, 9 * Cin).astype(mxu_dtype)
    w2k = jnp.transpose(params["w2"], (3, 0, 1, 2)).reshape(C, 9 * C).astype(mxu_dtype)
    g1 = params["g1"].reshape(C, 1).astype(jnp.float32)
    be1 = params["be1"].reshape(C, 1).astype(jnp.float32)
    g2 = params["g2"].reshape(C, 1).astype(jnp.float32)
    be2 = params["be2"].reshape(C, 1).astype(jnp.float32)

    xf = x.reshape(N, Cin, H * W)        # free metadata reshape (NCHW is contiguous)

    par1 = pltpu.CompilerParams(dimension_semantics=("parallel",))
    # Note: at production sizes set vmem_limit_bytes with headroom (esp. v7x,
    # 64 MiB physical); the toy shapes here fit the default scoped limit easily.

    # ---- stage 1: conv1 (+ fused 1x1 projection shortcut) + BN1 statistics --
    in_specs = [pl.BlockSpec((1, Cin, H * W), lambda n: (n, 0, 0)),
                pl.BlockSpec((C, 9 * Cin), lambda n: (0, 0))]
    args = [xf, w1k]
    if use_1x1conv:
        w3k = params["w3"][0, 0].T.astype(mxu_dtype)           # (C, Cin)
        b3k = params["b3"].reshape(C, 1).astype(jnp.float32)   # no BN after -> bias kept
        in_specs += [pl.BlockSpec((C, Cin), lambda n: (0, 0)),
                     pl.BlockSpec((C, 1), lambda n: (0, 0))]
        args += [w3k, b3k]

    out_shape = [jax.ShapeDtypeStruct((N, C, P), jnp.float32),
                 jax.ShapeDtypeStruct((N, C, 2), jnp.float32)]
    out_specs = [pl.BlockSpec((1, C, P), lambda n: (n, 0, 0)),
                 pl.BlockSpec((1, C, 2), lambda n: (n, 0, 0))]
    if use_1x1conv:
        out_shape.append(jax.ShapeDtypeStruct((N, C, P), jnp.float32))
        out_specs.append(pl.BlockSpec((1, C, P), lambda n: (n, 0, 0)))

    res = pl.pallas_call(
        functools.partial(_conv1_bn1stats_kernel, stride=s, H=H, W=W, Ho=Ho, Wo=Wo,
                          mxu_dtype=mxu_dtype, use_proj=use_1x1conv),
        out_shape=tuple(out_shape),
        grid=(N,),
        in_specs=in_specs,
        out_specs=tuple(out_specs),
        scratch_shapes=[pltpu.VMEM((Cin, H * W + 2 * (W + 1)), mxu_dtype),
                        pltpu.VMEM((9 * Cin, P), mxu_dtype)],
        compiler_params=par1,
    )(*args)
    if use_1x1conv:
        y1, st1, shortcut = res
    else:
        y1, st1 = res
        shortcut = xf                       # identity shortcut, already (N, C, P)

    # ---- stage 2: BN1 + ReLU + conv2 + BN2 statistics ------------------------
    y2, st2 = pl.pallas_call(
        functools.partial(_bn1_relu_conv2_bn2stats_kernel, Ho=Ho, Wo=Wo,
                          count=count, mxu_dtype=mxu_dtype),
        out_shape=(jax.ShapeDtypeStruct((N, C, P), jnp.float32),
                   jax.ShapeDtypeStruct((N, C, 2), jnp.float32)),
        grid=(N,),
        in_specs=[
            pl.BlockSpec((1, C, P), lambda n: (n, 0, 0)),
            pl.BlockSpec((N, C, 2), lambda n: (0, 0, 0)),
            pl.BlockSpec((C, 1), lambda n: (0, 0)),
            pl.BlockSpec((C, 1), lambda n: (0, 0)),
            pl.BlockSpec((C, 9 * C), lambda n: (0, 0)),
        ],
        out_specs=(pl.BlockSpec((1, C, P), lambda n: (n, 0, 0)),
                   pl.BlockSpec((1, C, 2), lambda n: (n, 0, 0))),
        scratch_shapes=[pltpu.VMEM((C, P + 2 * (Wo + 1)), mxu_dtype),
                        pltpu.VMEM((9 * C, P), mxu_dtype)],
        compiler_params=par1,
    )(y1, st1, g1, be1, w2k)

    # ---- stage 3: BN2 + shortcut add + ReLU (tiled over (sample, spatial)) ---
    rpt = max(1, min(Ho, 128 // Wo)) if Wo <= 128 else 1
    while Ho % rpt:
        rpt -= 1
    TP = rpt * Wo                      # >=128 lanes when the sample allows it
    RT = Ho // rpt

    out = pl.pallas_call(
        functools.partial(_bn2_add_relu_kernel, count=count),
        out_shape=jax.ShapeDtypeStruct((N, C, P), jnp.float32),
        grid=(N, RT),
        in_specs=[
            pl.BlockSpec((1, C, TP), lambda n, r: (n, 0, r)),
            pl.BlockSpec((N, C, 2), lambda n, r: (0, 0, 0)),
            pl.BlockSpec((C, 1), lambda n, r: (0, 0)),
            pl.BlockSpec((C, 1), lambda n, r: (0, 0)),
            pl.BlockSpec((1, C, TP), lambda n, r: (n, 0, r)),
        ],
        out_specs=pl.BlockSpec((1, C, TP), lambda n, r: (n, 0, r)),
        compiler_params=pltpu.CompilerParams(
            dimension_semantics=("parallel", "parallel")),
    )(y2, st2, g2, be2, shortcut)

    return out.reshape(N, C, Ho, Wo)


# --------------------------------------------------------------------------- reference (pure JAX)
def residual_reference(x, params, *, use_1x1conv=False, strides=1):
    dn = ("NCHW", "HWIO", "NCHW")

    def conv(x, w, b, stride, pad):
        y = lax.conv_general_dilated(x, w, (stride, stride),
                                     [(pad, pad), (pad, pad)],
                                     dimension_numbers=dn)
        return y + b.reshape(1, -1, 1, 1)

    def bn(y, g, bta):
        mean = jnp.mean(y, axis=(0, 2, 3), keepdims=True)
        var = jnp.mean((y - mean) ** 2, axis=(0, 2, 3), keepdims=True)
        return (y - mean) * lax.rsqrt(var + EPS) * g.reshape(1, -1, 1, 1) + bta.reshape(1, -1, 1, 1)

    y = jax.nn.relu(bn(conv(x, params["w1"], params["b1"], strides, 1),
                       params["g1"], params["be1"]))
    y = bn(conv(y, params["w2"], params["b2"], 1, 1), params["g2"], params["be2"])
    if use_1x1conv:
        x = conv(x, params["w3"], params["b3"], strides, 0)
    return jax.nn.relu(y + x)


# --------------------------------------------------------------------------- params
def make_params(key, in_channels, num_channels, use_1x1conv):
    ks = jax.random.split(key, 6)
    p = {
        "w1": 0.1 * jax.random.normal(ks[0], (3, 3, in_channels, num_channels), jnp.float32),
        "b1": 0.05 * jax.random.normal(ks[1], (num_channels,), jnp.float32),
        "w2": 0.1 * jax.random.normal(ks[2], (3, 3, num_channels, num_channels), jnp.float32),
        "b2": 0.05 * jax.random.normal(ks[3], (num_channels,), jnp.float32),
        "g1": jnp.ones((num_channels,), jnp.float32),
        "be1": jnp.zeros((num_channels,), jnp.float32),
        "g2": jnp.ones((num_channels,), jnp.float32),
        "be2": jnp.zeros((num_channels,), jnp.float32),
    }
    if use_1x1conv:
        p["w3"] = 0.1 * jax.random.normal(ks[4], (1, 1, in_channels, num_channels), jnp.float32)
        p["b3"] = 0.05 * jax.random.normal(ks[5], (num_channels,), jnp.float32)
    return p


# --------------------------------------------------------------------------- main
if __name__ == "__main__":
    key = jax.random.PRNGKey(0)
    kx, kp1, kp2 = jax.random.split(key, 3)

    x = jax.random.normal(kx, (2, 4, 16, 16), jnp.float32)  # NCHW, like PyTorch

    # Case 1: identity shortcut (use_1x1conv=False, strides=1, in==out channels).
    # b1/b2 exist in params but the kernels drop them (dead under training-mode
    # BN); the reference applies them, so this assert validates the cancellation.
    params1 = make_params(kp1, 4, 4, use_1x1conv=False)
    out1 = jax.block_until_ready(
        residual_forward(x, params1, use_1x1conv=False, strides=1))
    ref1 = residual_reference(x, params1, use_1x1conv=False, strides=1)
    assert out1.shape == (2, 4, 16, 16)
    assert jnp.allclose(out1, ref1, rtol=1e-3, atol=1e-3)

    # Case 2: projection shortcut (use_1x1conv=True, strides=2, 4 -> 8 channels).
    params2 = make_params(kp2, 4, 8, use_1x1conv=True)
    out2 = jax.block_until_ready(
        residual_forward(x, params2, use_1x1conv=True, strides=2))
    ref2 = residual_reference(x, params2, use_1x1conv=True, strides=2)
    assert out2.shape == (2, 8, 8, 8)
    assert jnp.allclose(out2, ref2, rtol=1e-3, atol=1e-3)

    # bf16 MXU-operand path (production setting on v5e/v6e/v7x).  Only matmul
    # rounding changes (BN statistics stay f32), so tolerance is loosened.
    out1b = jax.block_until_ready(
        residual_forward(x, params1, use_1x1conv=False, strides=1,
                         mxu_dtype=jnp.bfloat16))
    assert jnp.allclose(out1b, ref1, rtol=5e-2, atol=5e-2)

    print("KERNEL_OK")
</pallas_src>

<mosaic_0001>
module attributes {stable_mosaic.version = 11 : i64} {
  func.func @_conv1_bn1stats_kernel(%arg0: i32, %arg1: memref<1x4x256xf32, #tpu.memory_space<vmem>>, %arg2: memref<4x36xf32, #tpu.memory_space<vmem>>, %arg3: memref<1x4x256xf32, #tpu.memory_space<vmem>>, %arg4: memref<1x4x2xf32, #tpu.memory_space<vmem>>, %arg5: memref<4x290xf32, #tpu.memory_space<vmem>>, %arg6: memref<36x256xf32, #tpu.memory_space<vmem>>) attributes {dimension_semantics = [#tpu.dimension_semantics<parallel>], iteration_bounds = array<i64: 2>, scalar_prefetch = 0 : i64, scratch_operands = 2 : i64, tpu.core_type = #tpu.core_type<tc>, window_params = [{transform_indices = @transform_0, window_bounds = array<i64: 1, 4, 256>}, {pipeline_mode = #tpu.pipeline_mode<synchronous>, transform_indices = @transform_1, window_bounds = array<i64: 4, 36>}, {transform_indices = @transform_2, window_bounds = array<i64: 1, 4, 256>}, {transform_indices = @transform_3, window_bounds = array<i64: 1, 4, 2>}]} {
    %cst = arith.constant 0.000000e+00 : f32
    %0 = vector.broadcast %cst : f32 to vector<4x17xf32>
    %c0 = arith.constant 0 : index
    %c0_0 = arith.constant 0 : index
    %1 = vector.load %arg5[%c0, %c0_0] : memref<4x290xf32, #tpu.memory_space<vmem>>, vector<4x17xf32>
    tpu.vector_store %arg5[%c0, %c0_0], %0 {strides = array<i32>} : memref<4x290xf32, #tpu.memory_space<vmem>>, vector<4x17xf32>,
    %cst_1 = arith.constant 0.000000e+00 : f32
    %2 = vector.broadcast %cst_1 : f32 to vector<4x17xf32>
    %c0_2 = arith.constant 0 : index
    %c273 = arith.constant 273 : index
    %3 = vector.load %arg5[%c0_2, %c273] : memref<4x290xf32, #tpu.memory_space<vmem>>, vector<4x17xf32>
    tpu.vector_store %arg5[%c0_2, %c273], %2 {strides = array<i32>} : memref<4x290xf32, #tpu.memory_space<vmem>>, vector<4x17xf32>,
    %c0_3 = arith.constant 0 : index
    %c0_4 = arith.constant 0 : index
    %c0_5 = arith.constant 0 : index
    %4 = vector.load %arg1[%c0_3, %c0_4, %c0_5] : memref<1x4x256xf32, #tpu.memory_space<vmem>>, vector<1x4x256xf32>
    %5 = vector.shape_cast %4 : vector<1x4x256xf32> to vector<4x256xf32>
    %c0_6 = arith.constant 0 : index
    %c17 = arith.constant 17 : index
    %6 = vector.load %arg5[%c0_6, %c17] : memref<4x290xf32, #tpu.memory_space<vmem>>, vector<4x256xf32>
    tpu.vector_store %arg5[%c0_6, %c17], %5 {strides = array<i32>} : memref<4x290xf32, #tpu.memory_space<vmem>>, vector<4x256xf32>,
    %7 = tpu.iota {dimensions = array<i32: 1>} : vector<1x256xi32>
    %c16_i32 = arith.constant 16 : i32
    %c0_i32 = arith.constant 0 : i32
    %8 = arith.cmpi eq, %c16_i32, %c0_i32 : i32
    %c1_i32 = arith.constant 1 : i32
    %9 = arith.select %8, %c1_i32, %c16_i32 : i32
    %10 = vector.broadcast %9 : i32 to vector<1x256xi32>
    %11 = arith.remsi %7, %10 : vector<1x256xi32>
    %c0_i32_7 = arith.constant 0 : i32
    %12 = vector.broadcast %c0_i32_7 : i32 to vector<1x256xi32>
    %13 = arith.cmpi ne, %11, %12 : vector<1x256xi32>
    %c0_i32_8 = arith.constant 0 : i32
    %14 = vector.broadcast %c0_i32_8 : i32 to vector<1x256xi32>
    %15 = arith.cmpi slt, %11, %14 : vector<1x256xi32>
    %c0_i32_9 = arith.constant 0 : i32
    %16 = arith.cmpi slt, %9, %c0_i32_9 : i32
    %17 = vector.broadcast %16 : i1 to vector<1x256xi1>
    %18 = vector.broadcast %17 : vector<1x256xi1> to vector<1x256xi1>
    %19 = arith.xori %15, %18 : vector<1x256xi1>
    %20 = arith.andi %19, %13 : vector<1x256xi1>
    %21 = vector.broadcast %9 : i32 to vector<1x256xi32>
    %22 = arith.addi %11, %21 : vector<1x256xi32>
    %23 = arith.select %20, %22, %11 : vector<1x256xi1>, vector<1x256xi32>
    %c0_i32_10 = arith.constant 0 : i32
    %24 = vector.broadcast %c0_i32_10 : i32 to vector<1x256xi32>
    %25 = arith.cmpi ne, %23, %24 : vector<1x256xi32>
    %c15_i32 = arith.constant 15 : i32
    %26 = vector.broadcast %c15_i32 : i32 to vector<1x256xi32>
    %27 = arith.cmpi ne, %23, %26 : vector<1x256xi32>
    %c0_11 = arith.constant 0 : index
    %c0_12 = arith.constant 0 : index
    %28 = vector.load %arg5[%c0_11, %c0_12] : memref<4x290xf32, #tpu.memory_space<vmem>>, vector<4x256xf32>
    %cst_13 = arith.constant 0.000000e+00 : f32
    %29 = vector.shape_cast %25 : vector<1x256xi1> to vector<1x256xi1>
    %30 = vector.broadcast %29 : vector<1x256xi1> to vector<4x256xi1>
    %31 = vector.broadcast %cst_13 : f32 to vector<4x256xf32>
    %32 = arith.select %30, %28, %31 : vector<4x256xi1>, vector<4x256xf32>
    %c0_14 = arith.constant 0 : index
    %c0_15 = arith.constant 0 : index
    %33 = vector.load %arg6[%c0_14, %c0_15] : memref<36x256xf32, #tpu.memory_space<vmem>>, vector<4x256xf32>
    tpu.vector_store %arg6[%c0_14, %c0_15], %32 {strides = array<i32>} : memref<36x256xf32, #tpu.memory_space<vmem>>, vector<4x256xf32>,
    %c0_16 = arith.constant 0 : index
    %c1 = arith.constant 1 : index
    %34 = vector.load %arg5[%c0_16, %c1] : memref<4x290xf32, #tpu.memory_space<vmem>>, vector<4x256xf32>
    %c4 = arith.constant 4 : index
    %c0_17 = arith.constant 0 : index
    %35 = vector.load %arg6[%c4, %c0_17] : memref<36x256xf32, #tpu.memory_space<vmem>>, vector<4x256xf32>
    tpu.vector_store %arg6[%c4, %c0_17], %34 {strides = array<i32>} : memref<36x256xf32, #tpu.memory_space<vmem>>, vector<4x256xf32>,
    %c0_18 = arith.constant 0 : index
    %c2 = arith.constant 2 : index
    %36 = vector.load %arg5[%c0_18, %c2] : memref<4x290xf32, #tpu.memory_space<vmem>>, vector<4x256xf32>
    %cst_19 = arith.constant 0.000000e+00 : f32
    %37 = vector.shape_cast %27 : vector<1x256xi1> to vector<1x256xi1>
    %38 = vector.broadcast %37 : vector<1x256xi1> to vector<4x256xi1>
    %39 = vector.broadcast %cst_19 : f32 to vector<4x256xf32>
    %40 = arith.select %38, %36, %39 : vector<4x256xi1>, vector<4x256xf32>
    %c8 = arith.constant 8 : index
    %c0_20 = arith.constant 0 : index
    %41 = vector.load %arg6[%c8, %c0_20] : memref<36x256xf32, #tpu.memory_space<vmem>>, vector<4x256xf32>
    tpu.vector_store %arg6[%c8, %c0_20], %40 {strides = array<i32>} : memref<36x256xf32, #tpu.memory_space<vmem>>, vector<4x256xf32>,
    %c0_21 = arith.constant 0 : index
    %c16 = arith.constant 16 : index
    %42 = vector.load %arg5[%c0_21, %c16] : memref<4x290xf32, #tpu.memory_space<vmem>>, vector<4x256xf32>
    %cst_22 = arith.constant 0.000000e+00 : f32
    %43 = vector.shape_cast %25 : vector<1x256xi1> to vector<1x256xi1>
    %44 = vector.broadcast %43 : vector<1x256xi1> to vector<4x256xi1>
    %45 = vector.broadcast %cst_22 : f32 to vector<4x256xf32>
    %46 = arith.select %44, %42, %45 : vector<4x256xi1>, vector<4x256xf32>
    %c12 = arith.constant 12 : index
    %c0_23 = arith.constant 0 : index
    %47 = vector.load %arg6[%c12, %c0_23] : memref<36x256xf32, #tpu.memory_space<vmem>>, vector<4x256xf32>
    tpu.vector_store %arg6[%c12, %c0_23], %46 {strides = array<i32>} : memref<36x256xf32, #tpu.memory_space<vmem>>, vector<4x256xf32>,
    %c0_24 = arith.constant 0 : index
    %c17_25 = arith.constant 17 : index
    %48 = vector.load %arg5[%c0_24, %c17_25] : memref<4x290xf32, #tpu.memory_space<vmem>>, vector<4x256xf32>
    %c16_26 = arith.constant 16 : index
    %c0_27 = arith.constant 0 : index
    %49 = vector.load %arg6[%c16_26, %c0_27] : memref<36x256xf32, #tpu.memory_space<vmem>>, vector<4x256xf32>
    tpu.vector_store %arg6[%c16_26, %c0_27], %48 {strides = array<i32>} : memref<36x256xf32, #tpu.memory_space<vmem>>, vector<4x256xf32>,
    %c0_28 = arith.constant 0 : index
    %c18 = arith.constant 18 : index
    %50 = vector.load %arg5[%c0_28, %c18] : memref<4x290xf32, #tpu.memory_space<vmem>>, vector<4x256xf32>
    %cst_29 = arith.constant 0.000000e+00 : f32
    %51 = vector.shape_cast %27 : vector<1x256xi1> to vector<1x256xi1>
    %52 = vector.broadcast %51 : vector<1x256xi1> to vector<4x256xi1>
    %53 = vector.broadcast %cst_29 : f32 to vector<4x256xf32>
    %54 = arith.select %52, %50, %53 : vector<4x256xi1>, vector<4x256xf32>
    %c20 = arith.constant 20 : index
    %c0_30 = arith.constant 0 : index
    %55 = vector.load %arg6[%c20, %c0_30] : memref<36x256xf32, #tpu.memory_space<vmem>>, vector<4x256xf32>
    tpu.vector_store %arg6[%c20, %c0_30], %54 {strides = array<i32>} : memref<36x256xf32, #tpu.memory_space<vmem>>, vector<4x256xf32>,
    %c0_31 = arith.constant 0 : index
    %c32 = arith.constant 32 : index
    %56 = vector.load %arg5[%c0_31, %c32] : memref<4x290xf32, #tpu.memory_space<vmem>>, vector<4x256xf32>
    %cst_32 = arith.constant 0.000000e+00 : f32
    %57 = vector.shape_cast %25 : vector<1x256xi1> to vector<1x256xi1>
    %58 = vector.broadcast %57 : vector<1x256xi1> to vector<4x256xi1>
    %59 = vector.broadcast %cst_32 : f32 to vector<4x256xf32>
    %60 = arith.select %58, %56, %59 : vector<4x256xi1>, vector<4x256xf32>
    %c24 = arith.constant 24 : index
    %c0_33 = arith.constant 0 : index
    %61 = vector.load %arg6[%c24, %c0_33] : memref<36x256xf32, #tpu.memory_space<vmem>>, vector<4x256xf32>
    tpu.vector_store %arg6[%c24, %c0_33], %60 {strides = array<i32>} : memref<36x256xf32, #tpu.memory_space<vmem>>, vector<4x256xf32>,
    %c0_34 = arith.constant 0 : index
    %c33 = arith.constant 33 : index
    %62 = vector.load %arg5[%c0_34, %c33] : memref<4x290xf32, #tpu.memory_space<vmem>>, vector<4x256xf32>
    %c28 = arith.constant 28 : index
    %c0_35 = arith.constant 0 : index
    %63 = vector.load %arg6[%c28, %c0_35] : memref<36x256xf32, #tpu.memory_space<vmem>>, vector<4x256xf32>
    tpu.vector_store %arg6[%c28, %c0_35], %62 {strides = array<i32>} : memref<36x256xf32, #tpu.memory_space<vmem>>, vector<4x256xf32>,
    %c0_36 = arith.constant 0 : index
    %c34 = arith.constant 34 : index
    %64 = vector.load %arg5[%c0_36, %c34] : memref<4x290xf32, #tpu.memory_space<vmem>>, vector<4x256xf32>
    %cst_37 = arith.constant 0.000000e+00 : f32
    %65 = vector.shape_cast %27 : vector<1x256xi1> to vector<1x256xi1>
    %66 = vector.broadcast %65 : vector<1x256xi1> to vector<4x256xi1>
    %67 = vector.broadcast %cst_37 : f32 to vector<4x256xf32>
    %68 = arith.select %66, %64, %67 : vector<4x256xi1>, vector<4x256xf32>
    %c32_38 = arith.constant 32 : index
    %c0_39 = arith.constant 0 : index
    %69 = vector.load %arg6[%c32_38, %c0_39] : memref<36x256xf32, #tpu.memory_space<vmem>>, vector<4x256xf32>
    tpu.vector_store %arg6[%c32_38, %c0_39], %68 {strides = array<i32>} : memref<36x256xf32, #tpu.memory_space<vmem>>, vector<4x256xf32>,
    %c0_40 = arith.constant 0 : index
    %c0_41 = arith.constant 0 : index
    %70 = vector.load %arg2[%c0_40, %c0_41] : memref<4x36xf32, #tpu.memory_space<vmem>>, vector<4x36xf32>
    %c0_42 = arith.constant 0 : index
    %c0_43 = arith.constant 0 : index
    %71 = vector.load %arg6[%c0_42, %c0_43] : memref<36x256xf32, #tpu.memory_space<vmem>>, vector<36x256xf32>
    %cst_44 = arith.constant dense<0.000000e+00> : vector<4x256xf32>
    %72 = tpu.matmul %70, %71, %cst_44 {dimension_numbers = #tpu.dot_dimension_numbers<[1], [0], [0], [1], [0, 0, 1, 1], [], []>} : vector<4x36xf32>, vector<36x256xf32>, vector<4x256xf32> -> vector<4x256xf32>
    %c0_45 = arith.constant 0 : index
    %c0_46 = arith.constant 0 : index
    %c0_47 = arith.constant 0 : index
    %73 = vector.load %arg3[%c0_45, %c0_46, %c0_47] : memref<1x4x256xf32, #tpu.memory_space<vmem>>, vector<1x4x256xf32>
    %74 = vector.shape_cast %73 : vector<1x4x256xf32> to vector<4x256xf32>
    %75 = vector.shape_cast %72 : vector<4x256xf32> to vector<1x4x256xf32>
    tpu.vector_store %arg3[%c0_45, %c0_46, %c0_47], %75 {strides = array<i32>} : memref<1x4x256xf32, #tpu.memory_space<vmem>>, vector<1x4x256xf32>,
    %cst_48 = arith.constant dense<0.000000e+00> : vector<4xf32>
    %76 = vector.multi_reduction <add>, %72, %cst_48 [1] : vector<4x256xf32> to vector<4xf32>
    %77 = vector.shape_cast %76 : vector<4xf32> to vector<4x1xf32>
    %78 = arith.mulf %72, %72 : vector<4x256xf32>
    %cst_49 = arith.constant dense<0.000000e+00> : vector<4xf32>
    %79 = vector.multi_reduction <add>, %78, %cst_49 [1] : vector<4x256xf32> to vector<4xf32>
    %80 = vector.shape_cast %79 : vector<4xf32> to vector<4x1xf32>
    %81 = tpu.concatenate %77, %80 in 1 : vector<4x1xf32>, vector<4x1xf32> -> vector<4x2xf32>
    %c0_50 = arith.constant 0 : index
    %c0_51 = arith.constant 0 : index
    %c0_52 = arith.constant 0 : index
    %82 = vector.load %arg4[%c0_50, %c0_51, %c0_52] : memref<1x4x2xf32, #tpu.memory_space<vmem>>, vector<1x4x2xf32>
    %83 = vector.shape_cast %82 : vector<1x4x2xf32> to vector<4x2xf32>
    %84 = vector.shape_cast %81 : vector<4x2xf32> to vector<1x4x2xf32>
    tpu.vector_store %arg4[%c0_50, %c0_51, %c0_52], %84 {strides = array<i32>} : memref<1x4x2xf32, #tpu.memory_space<vmem>>, vector<1x4x2xf32>,
    return
  }
  func.func @transform_0(%arg0: i32) -> (i32, i32, i32) {
    %c0_i32 = arith.constant 0 : i32
    %c0_i32_0 = arith.constant 0 : i32
    %c0_i32_1 = arith.constant 0 : i32
    return %arg0, %c0_i32, %c0_i32_0 : i32, i32, i32
  }
  func.func @transform_1(%arg0: i32) -> (i32, i32) {
    %c0_i32 = arith.constant 0 : i32
    %c0_i32_0 = arith.constant 0 : i32
    %c0_i32_1 = arith.constant 0 : i32
    return %c0_i32, %c0_i32_0 : i32, i32
  }
  func.func @transform_2(%arg0: i32) -> (i32, i32, i32) {
    %c0_i32 = arith.constant 0 : i32
    %c0_i32_0 = arith.constant 0 : i32
    %c0_i32_1 = arith.constant 0 : i32
    return %arg0, %c0_i32, %c0_i32_0 : i32, i32, i32
  }
  func.func @transform_3(%arg0: i32) -> (i32, i32, i32) {
    %c0_i32 = arith.constant 0 : i32
    %c0_i32_0 = arith.constant 0 : i32
    %c0_i32_1 = arith.constant 0 : i32
    return %arg0, %c0_i32, %c0_i32_0 : i32, i32, i32
  }
}

</mosaic_0001>

<bundles_post_ra>
// kernel: tpu_custom_call.1
= control target key start
LH: loop header
LB: loop body
LE: loop exit
PB: predicated region body
PF: predicated region fallthrough
CT: control target
= control target key end

     0   :  { %9 = vsyncpa [#allocation5], 0  ;;  %s1234_s0 = inlined_call_operand.hbm [shape: f32[2,4,256], index: 0, kind: input, shape index: {}]   ;;  %s1235_s1 = inlined_call_operand.hbm [shape: f32[4,36], index: 1, kind: input, shape index: {}]   ;;  %s1236_s2 = inlined_call_operand.hbm [shape: f32[2,4,256], index: 2, kind: output, shape index: {0}]   ;;  %s1237_s3 = inlined_call_operand.vmem [shape: f32[2,4,2], index: 3, kind: output, shape index: {1}]  }
   0x1   :  { %11 = vsyncpa [#allocation5 + $0x1], 0 }
   0x2   :  { %12 = vsyncpa [#allocation8], 0 }
   0x3   :  { %13 = vsyncpa [#allocation6], 0 }
   0x4   :  { %15 = vsyncpa [#allocation6 + $0x1], 0  ;;  %s948_s12 = smov 0   ;;  %s950_s13 = smov 0  }
   0x5   :  { %s952_s14 = smov 0   ;;  %s954_s15 = smov 0  }
   0x6 LB: > { %s969_s16 = sadd.s32 4294967295, %s913_s15   ;;  %s684_s17 = sadd.s32 4294967294, %s913_s15   ;;  %s913_s15 = sphi %s954_s15, %s1269_s15   ;;  %s909_s14 = sphi %s952_s14, %s1268_s14   ;;  %s905_s13 = sphi %s950_s13, %s1267_s13   ;;  %s901_s12 = sphi %s948_s12, %s1266_s12  }
   0x7   : > { %p41_p0 = scmp.ne.s32.totalorder %s905_s13, %s901_s12  ;;  %p1238_p1 = scmp.eq.s32.totalorder %s969_s16, 0 }
   0x8   : > { %p92_p3 = scmp.eq.s32.totalorder %s684_s17, 1  ;;  %p685_p5 = scmp.ge.s32.totalorder %s913_s15, 1 }
   0x9   : > { %p978_p4 = por %p1238_p1, %p41_p0  ;;  %p125_p7 = scmp.lt.s32.totalorder %s913_s15, 3 }
   0xa   : > { %p983_p6 = por %p92_p3, %p41_p0  ;;  %s915_s21 = smov [#allocation7]  }
   0xb   : > { %s1241_s18 = scalar_select %p978_p4, 1, 0 }
   0xc   : > { %s1242_s19 = scalar_select %p983_p6, 1, 0 }
   0xd   : > { %p988_p8 = pnand %p685_p5, %p125_p7  ;;  %s138_s22 = sshll.u32 %s915_s21, 4  ;;  %s139_s22 = int_to_ptr.vmem [resolvable:$true] %s138_s22 }
   0xe   : > { %s996_s23 = sadd.s32 1, %s913_s15   ;;  %s28_s27 = sadd.s32 1, %s909_s14 }
   0xf   : > { %s1243_s20 = scalar_select %p988_p8, 1, 0 }
  0x10   : > { %p722_p10 = pneg %p988_p8  ;;  %s25_s25 = ssub.s32 %s913_s15, %s996_s23 }
  0x11   : > { %p1006_p12 = scmp.eq.s32.totalorder %s25_s25, 0  ;;  %s785_s30 = scalar_lea.hbm %s1235_s1, 64 }
  0x12   : > { %p1000_p11 = pnand %p722_p10, %p1238_p1  ;;  %p786_p0 = scmp.ne.s32.totalorder %s1235_s1, %s785_s30 }
  0x13   : > { %s1245_s26 = scalar_select %p1006_p12, 1, 0 }
  0x14   : > { %p787_p3 = pneg %p1000_p11  ;;  %p792_p10 = scmp.lt.u32.totalorder %s785_s30, %s1235_s1 }
  0x16   : > { %p788_p5 = pnand %p787_p3, %p786_p0 }
  0x18   : > { %p789_p7 = pneg %p788_p5 }
  0x1a   : > { %p794_p9 = pnand %p792_p10, %p789_p7 }
  0x1c   : > { %797 = shalt.err (!%p794_p9)
}
  0x1d   : > { %s798_s8 = scalar_lea.vmem %s139_s22, 64  ;;  %p806_p6 = scmp.lt.s32.totalorder %s139_s22, %s139_s22 }
  0x1e   : > { %p799_p1 = scmp.ne.s32.totalorder %s139_s22, %s798_s8  ;;  %p807_p4 = scmp.lt.s32.totalorder %s798_s8, %s798_s8 }
  0x20   : > { %p801_p2 = pnand %p799_p1, %p787_p3  ;;  %p808_p8 = por %p807_p4, %p806_p6 }
  0x22   : > { %p802_p13 = pneg %p801_p2 }
  0x24   : > { %p809_p12 = pnand %p808_p8, %p802_p13 }
  0x26   : > { %812 = shalt.err (!%p809_p12)
}
  0x27   : > { %725 = dma.hbm_to_vmem [thread:$0]  (!%p1000_p11), %s1235_s1, 64, %s139_s22, [#allocation8]  }
  0x28   : > { %p1246_p1 = scmp.ne.s32.totalorder %s1245_s26, 0  ;;  %p36_p2 = scmp.eq.s32.totalorder %s913_s15, 0 }
  0x29   : > { %p1247_p4 = scmp.ne.s32.totalorder %s909_s14, %s905_s13  ;;  %p1248_p6 = scmp.eq.s32.totalorder %s969_s16, 1 }
  0x2a   : > { %s1032_s11 = scalar_select %p1246_p1, %s909_s14, %s28_s27  }
  0x2b   : > { %p1040_p8 = por %p1248_p6, %p1247_p4  ;;  %p735_p9 = scmp.lt.s32.totalorder %s913_s15, 2 }
  0x2c   : > { %s149_s21 = sand.u32 1, %s909_s14   ;;  %p1250_p12 = pmov %p1247_p4 }
  0x2d   : > { %s688_s24 = sshll.u32 %s149_s21, 3  ;;  %s704_s25 = sshll.u32 %s913_s15, 7 }
  0x2e   : > { %p37_p13 = por %p36_p2, %p1250_p12  ;;  %s1053_s22 = scalar_lea.hbm %s1234_s0, %s704_s25 }
  0x2f   : > { %s153_s26 = scalar_lea.vmem [#allocation4], %s688_s24  ;;  %s150_s4 = scalar_lea.sflag [#allocation5], %s149_s21 }
  0x30   : > { %s161_s27 = sshll.u32 %s153_s26, 4  ;;  %p1055_p11 = pnand %p735_p9, %p37_p13  ;;  %s1059_s27 = int_to_ptr.vmem [resolvable:$true] %s161_s27 }
  0x31   : > { %s813_s5 = scalar_lea.hbm %s1053_s22, 128  ;;  %s818_s8 = scalar_lea.hbm %s1234_s0, 256 }
  0x32   : > { %p814_p0 = scmp.ne.s32.totalorder %s1053_s22, %s813_s5  ;;  %p815_p3 = pneg %p1055_p11 }
  0x33   : > { %p819_p10 = scmp.lt.u32.totalorder %s1053_s22, %s1234_s0  ;;  %p820_p1 = scmp.lt.u32.totalorder %s818_s8, %s813_s5 }
  0x34   : > { %p816_p5 = pnand %p815_p3, %p814_p0  ;;  %p822_p4 = scmp.lt.u32.totalorder %s813_s5, %s1053_s22 }
  0x35   : > { %p821_p2 = por %p820_p1, %p819_p10 }
  0x36   : > { %p817_p7 = pneg %p816_p5 }
  0x37   : > { %p823_p6 = por %p822_p4, %p821_p2 }
  0x39   : > { %p824_p9 = pnand %p823_p6, %p817_p7 }
  0x3b   : > { %827 = shalt.err (!%p824_p9)
}
  0x3c   : > { %s828_s21 = scalar_lea.vmem %s1059_s27, 128  ;;  %s916_s24 = smov [#allocation4]  }
  0x3d   : > { %p829_p12 = scmp.ne.s32.totalorder %s1059_s27, %s828_s21  ;;  %s833_s25 = sshll.u32 %s916_s24, 4  ;;  %s834_s25 = int_to_ptr.vmem [resolvable:$false] %s833_s25 }
  0x3e   : > { %s835_s28 = scalar_lea.vmem %s834_s25, 256  ;;  %p836_p5 = scmp.lt.s32.totalorder %s1059_s27, %s834_s25 }
  0x3f   : > { %p831_p13 = pnand %p829_p12, %p815_p3  ;;  %p837_p10 = scmp.lt.s32.totalorder %s835_s28, %s828_s21 }
  0x41   : > { %p832_p0 = pneg %p831_p13  ;;  %p838_p1 = por %p837_p10, %p836_p5 }
  0x43   : > { %p839_p2 = pnand %p838_p1, %p832_p0 }
  0x45   : > { %842 = shalt.err (!%p839_p2)
}
  0x46   : > { %729 = dma.hbm_to_vmem [thread:$0]  (!%p1055_p11), %s1053_s22, 128, %s1059_s27, %s150_s4  }
  0x47   : > { %p1252_p7 = scmp.ne.s32.totalorder %s1243_s20, 0 }
  0x48   : > { %s1089_s29 = sand.u32 (!%p1252_p7), 1, %s905_s13   ;;  %p1253_p3 = scmp.ne.s32.totalorder (!%p1252_p7), %s1241_s18, 0 }
  0x49   : > { %170 = sbr.rel (%p1252_p7) target bundleno = 744 (0x2e8), region = 28  ;;  %s692_s26 = sshll.u32 (!%p1252_p7), %s1089_s29, 3 }
  0x4a   : > { %s173_s5 = scalar_lea.sflag (!%p1252_p7), [#allocation5], %s1089_s29  ;;  %s176_s6 = scalar_lea.vmem (!%p1252_p7), [#allocation4], %s692_s26 }
  0x50   : > { %888 = dma.done.wait (%p1253_p3), %s173_s5, 128  }
  0x51   : > { %890 = vsyncadd (%p1253_p3), %s173_s5, 4294967168  ;;  %p1254_p11 = scmp.eq.s32.totalorder %s969_s16, 0 }
  0x53   : > { %892 = dma.done.wait (%p1254_p11), [#allocation8], 64   ;;  %p1255_p4 = pmov %p1254_p11 }
  0x54   : > { %vm211_vm0 = vcmask 134144   ;;  %vm213_vm1 = vcmask 273544   ;;  %v917_v0 = vmov 0.0   ;;  %v215_v1 = vld [vmem:[%s176_s6] sm:$0xff]  ;;  %s918_s20 = smov 17   ;;  %v229_v2 = vlaneseq  ;;  %s919_s18 = smov 96  }
  0x55   : > { %894 = vsyncadd (%p1255_p4), [#allocation8], 4294967232  ;;  %212 = vst.msk [vmem:[#allocation2] sm:$0xf] %vm211_vm0, %v917_v0  ;;  %530 = vmatprep.mubr.f32.mxu0 %v917_v0  ;;  %217 = vrot.lane.b32.xlu0 %v215_v1, %s918_s20  ;;  %vm224_vm2 = vcmask 1043592   ;;  %vm225_vm3 = vcmask 1047556  }
  0x56   : > { %214 = vst.msk [vmem:[#allocation2 + $0x8] sm:$0xf] %vm213_vm1, %v917_v0  ;;  %v1104_v3 = vand.u32 127, %v229_v2  ;;  %vm220_vm4 = vcmask 138240   ;;  %vm226_vm5 = vmor %vm225_vm3, %vm224_vm2  ;;  %s920_s22 = smov 112   ;;  %s921_s27 = smov 111  }
  0x57   : > { %s922_s30 = smov 126   ;;  %s923_s4 = smov 110   ;;  %vm284_vm8 = vcmask 1039360   ;;  %vm417_vm9 = vcmask 777216   ;;  %vm326_vm10 = vcmask 916480   ;;  %vm306_vm11 = vcmask 1031168  }
  0x58   : > { %v1108_v7 = vadd.s32 128, %v1104_v3  ;;  %v236_v8 = vand.u32 15, %v1104_v3  ;;  %s924_s7 = smov 127   ;;  %s925_s8 = smov 95   ;;  %vm370_vm14 = vcmask 900096   ;;  %vm396_vm15 = vcmask 785408  }
  0x59   : > { %s926_s9 = smov 94   ;;  %vm435_vm1 = vcmask 769024   ;;  %vm459_vm2 = vcmask 1043456   ;;  %vm455_vm3 = vcmask 293888   ;;  %s200_s10 = scalar_lea.vmem [#allocation9], %s692_s26 }
  0x5a   : > { %v243_v9 = vand.u32 15, %v1108_v7  ;;  %vm1114_vm6 = vcmp.ne.s32.totalorder %v236_v8, 0  ;;  %vm1147_vm12 = vcmp.ne.s32.totalorder %v236_v8, 15  ;;  %s705_s21 = sshll.u32 %s969_s16, 7  ;;  %s577_s5 = sshll.u32 %s200_s10, 4  ;;  %s578_s5 = int_to_ptr.vmem [resolvable:$true] %s577_s5 }
  0x5b   : > { %s1191_s28 = scalar_lea.hbm %s1236_s2, %s705_s21  ;;  %s559_s6 = scalar_lea.sflag [#allocation6], %s1089_s29 }
  0x5c   : > { %vm1122_vm7 = vcmp.ne.s32.totalorder %v243_v9, 0  ;;  %vm1153_vm13 = vcmp.ne.s32.totalorder %v243_v9, 15  ;;  %s843_s20 = scalar_lea.vmem %s578_s5, 128 }
  0x5d   : > { %p844_p6 = scmp.ne.s32.totalorder %s578_s5, %s843_s20 }
  0x5f   : > { %p845_p9 = pnand %p844_p6, %p1040_p8 }
  0x61   : > { %p846_p12 = pneg %p845_p9 }
  0xc7   : > { %v218_v4 = vpop.permute.xlu0 %217 }
  0xc8   : > { %v219_v5 = vrot.slane %v218_v4, 4 }
  0xca   : > { %v221_v6 = vsel %vm220_vm4, %v219_v5, %v218_v4  ;;  %228 = vst.msk [vmem:[#allocation2 + $0x8] sm:$0xf] %vm211_vm0, %v219_v5  ;;  %vm352_vm0 = vcmask 908288  }
  0xcb   : > { %227 = vst.msk [vmem:[#allocation2] sm:$0xff] %vm226_vm5, %v221_v6 }
  0xd1   : > { %v386_v10 = vld [vmem:[#allocation2 + $0x8] sm:$0xf] }
  0xd2   : > { %v316_v11 = vld [vmem:[#allocation2 + $0x8] sm:$0xf]  ;;  %394 = vrot.lane.b32.xlu0 %v386_v10, %s919_s18  ;;  %v272_v13 = vld [vmem:[#allocation2] sm:$0xff] }
  0xd3   : > { %324 = vrot.lane.b32.xlu1 %v316_v11, %s920_s22  ;;  %v319_v15 = vcombine.high %v272_v13, %v272_v13  ;;  %v268_v16 = vsel %vm1114_vm6, %v272_v13, 0.0  ;;  %v342_v17 = vld [vmem:[#allocation2 + $0x8] sm:$0xf]  ;;  %v276_v23 = vcombine.low %v272_v13, %v272_v13 }
  0xd4   : > { %v292_v18 = vld [vmem:[#allocation2 + $0x8] sm:$0xf]  ;;  %270 = vst [vmem:[#allocation3] sm:$0xf] %v268_v16 }
  0xd5   : > { %v269_v19 = vsel %vm1122_vm7, %v319_v15, 0.0  ;;  %v360_v20 = vld [vmem:[#allocation2 + $0x8] sm:$0xf] }
  0xd6   : > { %350 = vrot.lane.b32.xlu0 %v342_v17, %s921_s27  ;;  %271 = vst [vmem:[#allocation3 + $0x8] sm:$0xf] %v269_v19  ;;  %v783_v21 = vld [vmem:[#allocation2 + $0x8] ss:$0 sps:$4 sm:$0xff]  }
  0xd7   : > { %304 = vrot.lane.b32.xlu1 %v292_v18, %s922_s30  ;;  %v784_v22 = vld [vmem:[#allocation2 + $0x8] ss:$0 sps:$4 sm:$0xff]  }
  0xd8   : > { %v425_v24 = vld [vmem:[#allocation2 + $0x8] sm:$0xf] }
  0xda   : > { %280 = vrot.lane.b32.xlu0 %v272_v13, %s924_s7 }
  0xdb   : > { %368 = vrot.lane.b32.xlu1 %v360_v20, %s923_s4 }
  0xde   : > { %300 = vrot.lane.b32.xlu0 %v272_v13, %s922_s30 }
  0xdf   : > { %320 = vrot.lane.b32.xlu1 %v272_v13, %s920_s22 }
  0xe2   : > { %364 = vrot.lane.b32.xlu0 %v272_v13, %s923_s4 }
  0xe3   : > { %390 = vrot.lane.b32.xlu1 %v272_v13, %s919_s18 }
  0xe6   : > { %413 = vrot.lane.b32.xlu0 %v272_v13, %s925_s8 }
  0xe7   : > { %282 = vrot.lane.b32.xlu1 %v783_v21, %s924_s7 }
  0xea   : > { %322 = vrot.lane.b32.xlu0 %v319_v15, %s920_s22 }
  0xeb   : > { %415 = vrot.lane.b32.xlu1 %v784_v22, %s925_s8 }
  0xee   : > { %302 = vrot.lane.b32.xlu0 %v319_v15, %s922_s30 }
  0xef   : > { %278 = vrot.lane.b32.xlu1 %v276_v23, %s924_s7 }
  0xf2   : > { %366 = vrot.lane.b32.xlu0 %v319_v15, %s923_s4 }
  0xf3   : > { %392 = vrot.lane.b32.xlu1 %v319_v15, %s919_s18  ;;  %s927_s18 = smov [#allocation9]  }
  0xf4   : > { %s847_s26 = sshll.u32 %s927_s18, 4  ;;  %s848_s26 = int_to_ptr.vmem [resolvable:$false] %s847_s26 }
  0xf5   : > { %s849_s22 = scalar_lea.vmem %s848_s26, 256  ;;  %p850_p13 = scmp.lt.s32.totalorder %s578_s5, %s848_s26 }
  0xf6   : > { %346 = vrot.lane.b32.xlu0 %v272_v13, %s921_s27  ;;  %p851_p0 = scmp.lt.s32.totalorder %s849_s22, %s843_s20 }
  0xf7   : > { %348 = vrot.lane.b32.xlu1 %v319_v15, %s921_s27 }
  0xf8   : > { %p852_p5 = por %p851_p0, %p850_p13 }
  0xfa   : > { %431 = vrot.lane.b32.xlu0 %v319_v15, %s926_s9  ;;  %p853_p10 = pnand %p852_p5, %p846_p12 }
  0xfb   : > { %411 = vrot.lane.b32.xlu1 %v276_v23, %s925_s8 }
  0xfe   : > { %429 = vrot.lane.b32.xlu0 %v272_v13, %s926_s9 }
  0xff   : > { %433 = vrot.lane.b32.xlu1 %v425_v24, %s926_s9 }
 0x144   : > { %v395_v25 = vpop.permute.xlu0 %394 }
 0x145   : > { %v325_v26 = vpop.permute.xlu1 %324 }
 0x148   : > { %v1134_v27 = vpop.permute.xlu0 %350 }
 0x149   : > { %v305_v28 = vpop.permute.xlu1 %304 }
 0x14c   : > { %v281_v30 = vpop.permute.xlu0 %280 }
 0x14d   : > { %v369_v29 = vpop.permute.xlu1 %368 }
 0x150   : > { %v301_v32 = vpop.permute.xlu0 %300 }
 0x151   : > { %v321_v31 = vpop.permute.xlu1 %320 }
 0x154   : > { %v365_v34 = vpop.permute.xlu0 %364 }
 0x155   : > { %v391_v33 = vpop.permute.xlu1 %390 }
 0x158   : > { %v1136_v36 = vpop.permute.xlu0 %413 }
 0x159   : > { %v283_v35 = vpop.permute.xlu1 %282 }
 0x15a   : > { %v286_v37 = vsel %vm284_vm8, %v281_v30, %v283_v35 }
 0x15b   : > { %290 = vst [vmem:[#allocation3 + $0x8] sm:$0xf0] %v286_v37 }
 0x15c   : > { %v323_v39 = vpop.permute.xlu0 %322 }
 0x15d   : > { %v416_v38 = vpop.permute.xlu1 %415  ;;  %v327_v41 = vsel %vm326_vm10, %v321_v31, %v323_v39  ;;  %v328_v42 = vsel %vm326_vm10, %v323_v39, %v325_v26 }
 0x15e   : > { %v419_v40 = vsel %vm417_vm9, %v1136_v36, %v416_v38  ;;  %v331_v43 = vsel %vm1114_vm6, %v327_v41, 0.0  ;;  %v332_v44 = vsel %vm1122_vm7, %v328_v42, 0.0 }
 0x15f   : > { %423 = vst [vmem:[#allocation3 + $0x38] sm:$0xf0] %v419_v40  ;;  %v335_v45 = vrot.slane %v331_v43, 4  ;;  %v336_v46 = vrot.slane %v332_v44, 4 }
 0x160   : > { %v303_v49 = vpop.permute.xlu0 %302 }
 0x161   : > { %v279_v50 = vpop.permute.xlu1 %278  ;;  %339 = vst [vmem:[#allocation3 + $0x10] sm:$0xf0] %v335_v45  ;;  %340 = vst [vmem:[#allocation3 + $0x18] sm:$0xf0] %v336_v46  ;;  %v307_v51 = vsel %vm306_vm11, %v301_v32, %v303_v49  ;;  %v308_v52 = vsel %vm306_vm11, %v303_v49, %v305_v28 }
 0x162   : > { %v285_v53 = vsel %vm284_vm8, %v279_v50, %v281_v30  ;;  %v311_v54 = vsel %vm1147_vm12, %v307_v51, 0.0  ;;  %v312_v55 = vsel %vm1153_vm13, %v308_v52, 0.0  ;;  %v446_v9 = vld [vmem:[#allocation3 + $0x8] sm:$0xff] }
 0x163   : > { %289 = vst [vmem:[#allocation3] sm:$0xf0] %v285_v53  ;;  %313 = vst [vmem:[#allocation3 + $0x10] sm:$0xf] %v311_v54 }
 0x164   : > { %314 = vst [vmem:[#allocation3 + $0x18] sm:$0xf] %v312_v55  ;;  %v367_v56 = vpop.permute.xlu0 %366 }
 0x165   : > { %v393_v57 = vpop.permute.xlu1 %392  ;;  %v371_v58 = vsel %vm370_vm14, %v365_v34, %v367_v56  ;;  %v372_v59 = vsel %vm370_vm14, %v367_v56, %v369_v29  ;;  %v444_v29 = vld [vmem:[#allocation7] sm:$0xf] }
 0x166   : > { %v397_v60 = vsel %vm396_vm15, %v391_v33, %v393_v57  ;;  %v398_v61 = vsel %vm396_vm15, %v393_v57, %v395_v25  ;;  %v375_v62 = vsel %vm1147_vm12, %v371_v58, 0.0  ;;  %v376_v63 = vsel %vm1153_vm13, %v372_v59, 0.0 }
 0x167   : > { %v401_v0 = vsel %vm1114_vm6, %v397_v60, 0.0  ;;  %v402_v1 = vsel %vm1122_vm7, %v398_v61, 0.0  ;;  %v379_v2 = vrot.slane %v375_v62, 4  ;;  %v380_v3 = vrot.slane %v376_v63, 4 }
 0x168   : > { %403 = vst [vmem:[#allocation3 + $0x30] sm:$0xf] %v401_v0  ;;  %404 = vst [vmem:[#allocation3 + $0x38] sm:$0xf] %v402_v1  ;;  %v347_v4 = vpop.permute.xlu0 %346 }
 0x169   : > { %v349_v5 = vpop.permute.xlu1 %348  ;;  %383 = vst [vmem:[#allocation3 + $0x20] sm:$0xf0] %v379_v2  ;;  %384 = vst [vmem:[#allocation3 + $0x28] sm:$0xf0] %v380_v3 }
 0x16a   : > { %v353_v6 = vsel %vm352_vm0, %v347_v4, %v349_v5  ;;  %v354_v7 = vsel %vm352_vm0, %v349_v5, %v1134_v27  ;;  %v445_v8 = vld [vmem:[#allocation3] sm:$0xff]  ;;  %v447_v11 = vld [vmem:[#allocation3 + $0x10] sm:$0xff] }
 0x16b   : > { %357 = vst [vmem:[#allocation3 + $0x20] sm:$0xf] %v353_v6  ;;  %358 = vst [vmem:[#allocation3 + $0x28] sm:$0xf] %v354_v7  ;;  %v448_v10 = vld [vmem:[#allocation3 + $0x18] sm:$0xff]  ;;  %v708_v13 = vpack.c.bf16 %v447_v11, %v445_v8 }
 0x16c   : > { %v706_v12 = vpack.c.bf16 %v448_v10, %v446_v9  ;;  %v432_v14 = vpop.permute.xlu0 %431 }
 0x16d   : > { %v412_v15 = vpop.permute.xlu1 %411 }
 0x16e   : > { %v418_v16 = vsel %vm417_vm9, %v412_v15, %v1136_v36  ;;  %707 = vmatprep.subr.bf16.mxu0 %v706_v12 }
 0x16f   : > { %422 = vst [vmem:[#allocation3 + $0x30] sm:$0xf0] %v418_v16  ;;  %709 = vmatpush1.bf16.msra.mxu0 %v708_v13  ;;  %v452_v22 = vld [vmem:[#allocation3 + $0x38] sm:$0xff] }
 0x170   : > { %v430_v17 = vpop.permute.xlu0 %429 }
 0x171   : > { %v434_v18 = vpop.permute.xlu1 %433  ;;  %v436_v19 = vsel %vm435_vm1, %v430_v17, %v432_v14 }
 0x172   : > { %v437_v20 = vsel %vm435_vm1, %v432_v14, %v434_v18  ;;  %v450_v21 = vld [vmem:[#allocation3 + $0x28] sm:$0xff]  ;;  %v440_v23 = vsel %vm1147_vm12, %v436_v19, 0.0  ;;  %v449_v26 = vld [vmem:[#allocation3 + $0x20] sm:$0xff] }
 0x173   : > { %v441_v24 = vsel %vm1153_vm13, %v437_v20, 0.0  ;;  %v710_v25 = vpack.c.bf16 %v452_v22, %v450_v21  ;;  %442 = vst [vmem:[#allocation3 + $0x40] sm:$0xf] %v440_v23 }
 0x174   : > { %443 = vst [vmem:[#allocation3 + $0x48] sm:$0xf] %v441_v24 }
 0x175   : > { %711 = vmatprep.subr.bf16.mxu0 %v710_v25 }
 0x176   : > { %v451_v27 = vld [vmem:[#allocation3 + $0x30] sm:$0xff] }
 0x177   : > { %v712_v28 = vpack.c.bf16 %v451_v27, %v449_v26 }
 0x179   : > { %713 = vmatpush1.bf16.msra.mxu0 %v712_v28 }
 0x17a   : > { %v453_v31 = vld [vmem:[#allocation3 + $0x40] sm:$0xf] }
 0x17b   : > { %v454_v30 = vld [vmem:[#allocation3 + $0x48] sm:$0xf] }
 0x17c   : > { %696 = vmatprep.subr.msk.mxu0 %vm459_vm2, %v454_v30 }
 0x17d   : > { %697 = vmatpush1.msk.msra.mxu0 %vm459_vm2, %v453_v31 }
 0x17e   : > { %698 = vmatmul.mubr.msk.f32.vlgmr.msra.gmra.mrb[0].mxu0 %vm455_vm3, %v444_v29 }
 0x251   : > { %v532_v32 = vpop.f32.mrb[0].mxu0 }
 0x252   : > { %v547_v33 = vmul.f32 %v532_v32, %v532_v32  ;;  %v534_v34 = vpop.f32.mrb[1].mxu0  ;;  %v542_v35 = vsel %vm459_vm2, %v532_v32, 0.0 }
 0x253   : > { %v539_v36 = vcombine.low %v532_v32, %v534_v34  ;;  %v543_v37 = vsel %vm459_vm2, %v534_v34, 0.0  ;;  %v548_v38 = vmul.f32 %v534_v34, %v534_v34 }
 0x254   : > { %v544_v39 = vadd.f32 %v543_v37, %v542_v35  ;;  %v549_v40 = vsel %vm459_vm2, %v547_v33, 0.0 }
 0x255   : > { %v550_v41 = vsel %vm459_vm2, %v548_v38, 0.0  ;;  %541 = vst [vmem:[%s200_s10] sm:$0xff] %v539_v36 }
 0x256   : > { %545 = vadd.xlane.f32.xlu1 %v544_v39  ;;  %v551_v42 = vadd.f32 %v550_v41, %v549_v40 }
 0x258   : > { %552 = vadd.xlane.f32.xlu0 %v551_v42 }
 0x259   : > { %856 = shalt.err (!%p853_p10)
}
 0x25a   : > { %s857_s29 = scalar_lea.hbm %s1191_s28, 128  ;;  %s861_s4 = scalar_lea.hbm %s1236_s2, 256 }
 0x25b   : > { %p858_p1 = scmp.ne.s32.totalorder %s1191_s28, %s857_s29  ;;  %p862_p3 = scmp.lt.u32.totalorder %s1191_s28, %s1236_s2 }
 0x25c   : > { %p863_p11 = scmp.lt.u32.totalorder %s861_s4, %s857_s29  ;;  %p865_p6 = scmp.lt.u32.totalorder %s857_s29, %s1191_s28 }
 0x25d   : > { %p859_p2 = pnand %p858_p1, %p1040_p8 }
 0x25e   : > { %p864_p4 = por %p863_p11, %p862_p3 }
 0x25f   : > { %p860_p7 = pneg %p859_p2 }
 0x260   : > { %p866_p9 = por %p865_p6, %p864_p4 }
 0x262   : > { %p867_p12 = pnand %p866_p9, %p860_p7 }
 0x264   : > { %870 = shalt.err (!%p867_p12)
}
 0x265   : > { %720 = dma.vmem_to_hbm [thread:$0]  (%p1040_p8), %s578_s5, 128, %s1191_s28, %s559_s6   ;;  %vm554_vm4 = vcmask 7168   ;;  %vm556_vm5 = vcmask 11264  }
 0x266   : > { %p207_p13 = scmp.lt.s32.totalorder %s969_s16, 1 }
 0x268   : > { %s1271_s16 = smov (!%p207_p13, %s969_s16), 1 }
 0x269   : > { %s695_s9 = sshll.u32 %s1271_s16, 2 }
 0x26a   : > { %s210_s24 = scalar_lea.vmem %s1237_s3, %s695_s9 }
 0x2e3   : > { %v546_v43 = vpop.xlane.xlu1 %545 }
 0x2e5   : > { %v553_v44 = vpop.xlane.xlu0 %552 }
 0x2e6   : > { %v555_v45 = vsel %vm554_vm4, %v546_v43, %v553_v44 }
 0x2e7   : > { %557 = vst.msk [vmem:[%s210_s24] sm:$0xf] %vm556_vm5, %v555_v45 }
 0x2e8 PF: > { %s592_s17 = sand.u32 1, %s901_s12   ;;  %p1264_p0 = scmp.ne.s32.totalorder %s1242_s19, 0 }
 0x2e9   : > { %p1265_p8 = scmp.ge.s32.totalorder %s913_s15, 2  ;;  %s593_s25 = scalar_lea.sflag [#allocation6], %s592_s17 }
 0x2eb   : > { %p731_p5 = pnand %p1265_p8, %p1264_p0 }
 0x2ed   : > { %896 = dma.done.wait (!%p731_p5), %s593_s25, 128  }
 0x2ee   : > { %898 = vsyncadd (!%p731_p5), %s593_s25, 4294967168  ;;  %p18_p10 = scmp.ge.s32.totalorder %s996_s23, 4   ;;  %s1266_s12 = smov %s905_s13 }
 0x2ef   : > { %s1267_s13 = smov %s909_s14  ;;  %s1268_s14 = smov %s1032_s11 }
 0x2f0   : > { %s1269_s15 = smov %s996_s23  ;;  %20 = sbr.rel (!%p18_p10) target bundleno = 6 (0x6), region = 89 }
 0x2f7   :  { %605 = vsyncpa [#allocation5], 1 }
 0x2f8   :  { %607 = vsyncpa [#allocation5 + $0x1], 1 }
 0x2f9   :  { %608 = vsyncpa [#allocation8], 1 }
 0x2fa   :  { %609 = vsyncpa [#allocation6], 1 }
 0x2fb   :  { %611 = vsyncpa [#allocation6 + $0x1], 1 }

</bundles_post_ra>
